<compile_context>
chip_gen: v5e
topology: v5e:2x2
jax: 0.10.0
libtpu: 0.0.40
codegen_flags: <defaults>
</compile_context>

<pallas_src>
import jax
import jax.numpy as jnp
from jax import lax
from jax.experimental import pallas as pl
from jax.experimental.pallas import tpu as pltpu

LANES = 128
SUBLANES = 8
MAX_BLOCK_ROWS = 8192          # 8192 x 128 f32 = 4 MiB per input block
CHUNK_ROWS = 1024              # in-kernel compute chunk (temporaries ~0.5 MiB)
VMEM_LIMIT_BYTES = 40 * 1024 * 1024   # < physical VMEM on v5e/v6e/v7x


def _round_up(x: int, m: int) -> int:
    return (x + m - 1) // m * m


def _row_align(dtype) -> int:
    # Minimum sublane tile: 8 rows for 4-byte, 16 for 2-byte, 32 for 1-byte.
    return max(SUBLANES, 32 // jnp.dtype(dtype).itemsize)


def _num_tensorcores() -> int:
    """Best-effort TensorCores per device (2 on megacore v4/v5p and v7x)."""
    try:
        kind = jax.devices()[0].device_kind.lower()
    except Exception:
        return 1
    if "lite" in kind or "v5e" in kind or "v6" in kind:
        return 1
    if any(tag in kind for tag in ("v7", "7x", "v5p", "v4")):
        return 2
    return 1


def _make_focal_kernel(*, alpha: float, gamma: float, block_rows: int,
                       chunk_rows: int, n_chunks: int, num_cores: int,
                       n_elems: int, needs_mask: bool):
    gamma = float(gamma)
    int_gamma = int(round(gamma)) if gamma == round(gamma) else None
    block_elems = block_rows * LANES
    chunk_elems = chunk_rows * LANES

    def kernel(x_ref, t_ref, o_ref):
        c = pl.program_id(0)          # TensorCore shard ("parallel")
        i = pl.program_id(1)          # row-tile index  ("arbitrary" reduction)

        @pl.when(i == 0)
        def _():
            o_ref[...] = jnp.zeros_like(o_ref)

        # Tiles are round-robined across cores.  A "phantom" tile (index past
        # the last real tile) is clamped onto the last tile by the index_map
        # and fully masked to zero below.
        tile_idx = i * num_cores + c
        tile_start_elem = tile_idx * block_elems

        def accumulate(v):
            # Lockstep VPU accumulation into the vreg-shaped (8,128) partial
            # sum held in the VMEM-resident output block.
            o_ref[...] += jnp.sum(
                v.reshape(chunk_rows // SUBLANES, SUBLANES, LANES), axis=0)

        def chunk_body(j):
            row0 = j * chunk_rows
            if not isinstance(row0, int):
                row0 = pl.multiple_of(row0, chunk_rows)
            x = x_ref[pl.ds(row0, chunk_rows), :].astype(jnp.float32)
            t = t_ref[pl.ds(row0, chunk_rows), :].astype(jnp.float32)

            # One exp per element feeds both sigmoid and the stable BCE:
            #   e  = exp(-|x|)
            #   p  = sigmoid(x) = where(x>=0, 1/(1+e), e/(1+e))
            #   ce = max(x,0) - x*t + log1p(e)
            e = jnp.exp(-jnp.abs(x))
            inv = pl.reciprocal(1.0 + e, approx=True)   # EUP slot, off the VALU
            p = jnp.where(x >= 0, inv, e * inv)
            ce = jnp.maximum(x, 0.0) - x * t + jnp.log1p(e)

            # 1 - p_t == p + t - 2*p*t   (algebraically simplified)
            s = p + t - 2.0 * (p * t)

            if int_gamma is not None and 0 <= int_gamma <= 8:
                focal = None
                if int_gamma > 0:
                    focal = s
                    for _ in range(int_gamma - 1):
                        focal = focal * s
            else:
                focal = s ** gamma
            loss = ce if focal is None else ce * focal

            if alpha >= 0:
                # alpha_t == (1 - alpha) + (2*alpha - 1) * t
                loss = ((1.0 - alpha) + (2.0 * alpha - 1.0) * t) * loss

            if not needs_mask:
                accumulate(loss)
            else:
                chunk_start = tile_start_elem + row0 * LANES
                chunk_full = chunk_start + chunk_elems <= n_elems

                @pl.when(chunk_full)              # steady state: no mask cost
                def _():
                    accumulate(loss)

                @pl.when(jnp.logical_not(chunk_full))   # ragged / phantom tail
                def _():
                    rid = lax.broadcasted_iota(jnp.int32, loss.shape, 0)
                    lid = lax.broadcasted_iota(jnp.int32, loss.shape, 1)
                    eid = chunk_start + rid * LANES + lid
                    accumulate(jnp.where(eid < n_elems, loss, 0.0))

        if n_chunks == 1:
            chunk_body(0)
        else:
            pl.loop(0, n_chunks)(chunk_body)

    return kernel


def focal_loss(inputs, targets, alpha: float = 0.25, gamma: float = 2.0,
               reduction: str = "mean", num_cores=None):
    """Pallas TPU implementation of sigmoid focal loss ('mean' or 'sum')."""
    assert inputs.shape == targets.shape
    assert reduction in ("mean", "sum")
    # TODO(synk): reduction='none' (elementwise output map) is not wired up.

    n_elems = int(inputs.size)
    x = inputs.reshape(-1)
    t = targets.reshape(-1)

    # Lane alignment only: pad by at most 127 elements so the (rows, 128)
    # reshape is valid.  (The old version padded all the way to the block
    # grid, costing a full extra HBM pass; ragged tiles are now in-kernel.)
    if n_elems % LANES:
        pad = LANES - n_elems % LANES
        x = jnp.pad(x, (0, pad))
        t = jnp.pad(t, (0, pad))
    rows = pl.cdiv(n_elems, LANES)
    x2 = x.reshape(rows, LANES)
    t2 = t.reshape(rows, LANES)
    # NOTE: hard {0,1} labels may be supplied as bf16/int8 -- the kernel
    # upcasts to f32 and narrower targets cut HBM traffic ~25-37%.

    if num_cores is None:
        num_cores = _num_tensorcores()
    if rows <= CHUNK_ROWS:
        num_cores = 1                  # not worth sharding a single small tile

    row_align = max(_row_align(x2.dtype), _row_align(t2.dtype))
    rows_per_core = pl.cdiv(rows, num_cores)
    if rows_per_core <= CHUNK_ROWS:
        block_rows = _round_up(rows_per_core, row_align)
    else:
        block_rows = min(MAX_BLOCK_ROWS, _round_up(rows_per_core, CHUNK_ROWS))
    chunk_rows = min(block_rows, CHUNK_ROWS)
    n_chunks = block_rows // chunk_rows

    total_tiles = pl.cdiv(rows, block_rows)
    tiles_per_core = pl.cdiv(total_tiles, num_cores)
    covered_elems = num_cores * tiles_per_core * block_rows * LANES
    needs_mask = covered_elems != n_elems

    kernel = _make_focal_kernel(
        alpha=float(alpha), gamma=float(gamma), block_rows=block_rows,
        chunk_rows=chunk_rows, n_chunks=n_chunks, num_cores=num_cores,
        n_elems=n_elems, needs_mask=needs_mask)

    def in_index_map(c, i):
        # Round-robin tiles across cores; clamp phantom tiles onto the last
        # real tile (the kernel masks their contribution to zero).
        return (jnp.minimum(i * num_cores + c, total_tiles - 1), 0)

    partials = pl.pallas_call(
        kernel,
        out_shape=jax.ShapeDtypeStruct((num_cores * SUBLANES, LANES),
                                       jnp.float32),
        grid_spec=pltpu.PrefetchScalarGridSpec(
            num_scalar_prefetch=0,
            grid=(num_cores, tiles_per_core),
            in_specs=[
                pl.BlockSpec((block_rows, LANES), in_index_map),
                pl.BlockSpec((block_rows, LANES), in_index_map),
            ],
            out_specs=pl.BlockSpec((SUBLANES, LANES), lambda c, i: (c, 0)),
        ),
        compiler_params=pltpu.CompilerParams(
            dimension_semantics=("parallel", "arbitrary"),
            vmem_limit_bytes=VMEM_LIMIT_BYTES),
    )(x2, t2)

    total = jnp.sum(partials)
    if reduction == "mean":
        total = total / jnp.float32(n_elems)
    return total


def _focal_loss_ref(inputs, targets, alpha=0.25, gamma=2.0, reduction="mean"):
    x = inputs.astype(jnp.float32)
    t = targets.astype(jnp.float32)
    p = jax.nn.sigmoid(x)
    ce = jnp.maximum(x, 0.0) - x * t + jnp.log1p(jnp.exp(-jnp.abs(x)))
    p_t = p * t + (1 - p) * (1 - t)
    loss = ce * (1 - p_t) ** gamma
    if alpha >= 0:
        alpha_t = alpha * t + (1 - alpha) * (1 - t)
        loss = alpha_t * loss
    return loss.mean() if reduction == "mean" else loss.sum()


if __name__ == "__main__":
    key = jax.random.PRNGKey(0)
    k1, k2, k3, k4, k5, k6 = jax.random.split(key, 6)

    # 1) Dense-prediction style NCHW logits/targets at the spec's small shape.
    shape = (2, 4, 16, 16)
    logits = jax.random.normal(k1, shape, dtype=jnp.float32) * 2.0
    targets = (jax.random.uniform(k2, shape) > 0.5).astype(jnp.float32)
    out = jax.block_until_ready(
        focal_loss(logits, targets, alpha=0.25, gamma=2.0, reduction="mean"))
    ref = _focal_loss_ref(logits, targets)
    assert jnp.allclose(out, ref, rtol=2e-3, atol=1e-6), (out, ref)

    # 2) Misaligned shape (exercises the <=127-elem pad + ragged mask), hard
    #    labels stored as bf16 (halves target HBM bytes), 'sum' reduction.
    shape2 = (2, 3, 15, 17)
    logits2 = jax.random.normal(k3, shape2, dtype=jnp.float32) * 2.0
    targets2 = (jax.random.uniform(k4, shape2) > 0.5).astype(jnp.bfloat16)
    out2 = jax.block_until_ready(
        focal_loss(logits2, targets2, alpha=0.25, gamma=2.0, reduction="sum"))
    ref2 = _focal_loss_ref(logits2, targets2, reduction="sum")
    assert jnp.allclose(out2, ref2, rtol=2e-3, atol=1e-4), (out2, ref2)

    # 3) Larger ragged shape: multiple row tiles + in-kernel chunk loop.
    shape3 = (2, 4, 370, 372)
    logits3 = jax.random.normal(k5, shape3, dtype=jnp.float32) * 2.0
    targets3 = (jax.random.uniform(k6, shape3) > 0.5).astype(jnp.float32)
    out3 = jax.block_until_ready(
        focal_loss(logits3, targets3, alpha=0.25, gamma=2.0, reduction="mean"))
    ref3 = _focal_loss_ref(logits3, targets3)
    assert jnp.allclose(out3, ref3, rtol=2e-3, atol=1e-6), (out3, ref3)

    print("KERNEL_OK")
</pallas_src>

<mosaic_0001>
module attributes {stable_mosaic.version = 11 : i64} {
  func.func @kernel(%arg0: i32, %arg1: i32, %arg2: memref<16x128xf32, #tpu.memory_space<vmem>>, %arg3: memref<16x128xf32, #tpu.memory_space<vmem>>, %arg4: memref<8x128xf32, #tpu.memory_space<vmem>>) attributes {dimension_semantics = [#tpu.dimension_semantics<parallel>, #tpu.dimension_semantics<arbitrary>], iteration_bounds = array<i64: 1, 1>, scalar_prefetch = 0 : i64, scratch_operands = 0 : i64, tpu.core_type = #tpu.core_type<tc>, window_params = [{transform_indices = @transform_0, window_bounds = array<i64: 16, 128>}, {transform_indices = @transform_1, window_bounds = array<i64: 16, 128>}, {transform_indices = @transform_2, window_bounds = array<i64: 8, 128>}]} {
    %c0_i32 = arith.constant 0 : i32
    %0 = arith.cmpi eq, %arg1, %c0_i32 : i32
    %1 = arith.extui %0 : i1 to i32
    %c0_i32_0 = arith.constant 0 : i32
    %2 = arith.cmpi ne, %1, %c0_i32_0 : i32
    scf.if %2 {
      %cst_15 = arith.constant 0.000000e+00 : f32
      %39 = vector.broadcast %cst_15 : f32 to vector<8x128xf32>
      %c0_16 = arith.constant 0 : index
      %c0_17 = arith.constant 0 : index
      %40 = vector.load %arg4[%c0_16, %c0_17] : memref<8x128xf32, #tpu.memory_space<vmem>>, vector<8x128xf32>
      tpu.vector_store %arg4[%c0_16, %c0_17], %39 {strides = array<i32>} : memref<8x128xf32, #tpu.memory_space<vmem>>, vector<8x128xf32>,
    } else {
    }
    %c0 = arith.constant 0 : index
    %c0_1 = arith.constant 0 : index
    %3 = vector.load %arg2[%c0, %c0_1] : memref<16x128xf32, #tpu.memory_space<vmem>>, vector<16x128xf32>
    %c0_2 = arith.constant 0 : index
    %c0_3 = arith.constant 0 : index
    %4 = vector.load %arg3[%c0_2, %c0_3] : memref<16x128xf32, #tpu.memory_space<vmem>>, vector<16x128xf32>
    %5 = math.absf %3 : vector<16x128xf32>
    %cst = arith.constant 0.000000e+00 : f32
    %6 = vector.broadcast %cst : f32 to vector<16x128xf32>
    %7 = arith.subf %6, %5 : vector<16x128xf32>
    %8 = math.exp %7 : vector<16x128xf32>
    %cst_4 = arith.constant 1.000000e+00 : f32
    %9 = vector.broadcast %cst_4 : f32 to vector<16x128xf32>
    %10 = arith.addf %9, %8 : vector<16x128xf32>
    %11 = tpu.reciprocal %10 {approx = true} : vector<16x128xf32> -> vector<16x128xf32>
    %cst_5 = arith.constant 0.000000e+00 : f32
    %12 = vector.broadcast %cst_5 : f32 to vector<16x128xf32>
    %13 = arith.cmpf oge, %3, %12 : vector<16x128xf32>
    %14 = arith.mulf %8, %11 : vector<16x128xf32>
    %15 = arith.select %13, %11, %14 : vector<16x128xi1>, vector<16x128xf32>
    %cst_6 = arith.constant 0.000000e+00 : f32
    %16 = vector.broadcast %cst_6 : f32 to vector<16x128xf32>
    %17 = arith.maximumf %3, %16 : vector<16x128xf32>
    %18 = arith.mulf %3, %4 : vector<16x128xf32>
    %19 = arith.subf %17, %18 : vector<16x128xf32>
    %20 = math.log1p %8 : vector<16x128xf32>
    %21 = arith.addf %19, %20 : vector<16x128xf32>
    %22 = arith.addf %15, %4 : vector<16x128xf32>
    %23 = arith.mulf %15, %4 : vector<16x128xf32>
    %cst_7 = arith.constant 2.000000e+00 : f32
    %24 = vector.broadcast %cst_7 : f32 to vector<16x128xf32>
    %25 = arith.mulf %24, %23 : vector<16x128xf32>
    %26 = arith.subf %22, %25 : vector<16x128xf32>
    %27 = arith.mulf %26, %26 : vector<16x128xf32>
    %28 = arith.mulf %21, %27 : vector<16x128xf32>
    %cst_8 = arith.constant -5.000000e-01 : f32
    %29 = vector.broadcast %cst_8 : f32 to vector<16x128xf32>
    %30 = arith.mulf %29, %4 : vector<16x128xf32>
    %cst_9 = arith.constant 7.500000e-01 : f32
    %31 = vector.broadcast %cst_9 : f32 to vector<16x128xf32>
    %32 = arith.addf %31, %30 : vector<16x128xf32>
    %33 = arith.mulf %32, %28 : vector<16x128xf32>
    %c0_10 = arith.constant 0 : index
    %c0_11 = arith.constant 0 : index
    %34 = vector.load %arg4[%c0_10, %c0_11] : memref<8x128xf32, #tpu.memory_space<vmem>>, vector<8x128xf32>
    %35 = vector.shape_cast %33 : vector<16x128xf32> to vector<2x8x128xf32>
    %cst_12 = arith.constant dense<0.000000e+00> : vector<8x128xf32>
    %36 = vector.multi_reduction <add>, %35, %cst_12 [0] : vector<2x8x128xf32> to vector<8x128xf32>
    %37 = arith.addf %34, %36 : vector<8x128xf32>
    %c0_13 = arith.constant 0 : index
    %c0_14 = arith.constant 0 : index
    %38 = vector.load %arg4[%c0_13, %c0_14] : memref<8x128xf32, #tpu.memory_space<vmem>>, vector<8x128xf32>
    tpu.vector_store %arg4[%c0_13, %c0_14], %37 {strides = array<i32>} : memref<8x128xf32, #tpu.memory_space<vmem>>, vector<8x128xf32>,
    return
  }
  func.func @transform_0(%arg0: i32, %arg1: i32) -> (i32, i32) {
    %c1_i32 = arith.constant 1 : i32
    %0 = arith.muli %arg1, %c1_i32 : i32
    %1 = arith.addi %0, %arg0 : i32
    %c0_i32 = arith.constant 0 : i32
    %2 = arith.minsi %1, %c0_i32 : i32
    %c0_i32_0 = arith.constant 0 : i32
    %c0_i32_1 = arith.constant 0 : i32
    return %2, %c0_i32_0 : i32, i32
  }
  func.func @transform_1(%arg0: i32, %arg1: i32) -> (i32, i32) {
    %c1_i32 = arith.constant 1 : i32
    %0 = arith.muli %arg1, %c1_i32 : i32
    %1 = arith.addi %0, %arg0 : i32
    %c0_i32 = arith.constant 0 : i32
    %2 = arith.minsi %1, %c0_i32 : i32
    %c0_i32_0 = arith.constant 0 : i32
    %c0_i32_1 = arith.constant 0 : i32
    return %2, %c0_i32_0 : i32, i32
  }
  func.func @transform_2(%arg0: i32, %arg1: i32) -> (i32, i32) {
    %c0_i32 = arith.constant 0 : i32
    %c0_i32_0 = arith.constant 0 : i32
    return %arg0, %c0_i32 : i32, i32
  }
}

</mosaic_0001>

<bundles_post_ra>
// kernel: tpu_custom_call.1
= control target key start
LH: loop header
LB: loop body
LE: loop exit
PB: predicated region body
PF: predicated region fallthrough
CT: control target
= control target key end

     0   :  { %7 = vsyncpa [#allocation3], 0  ;;  %s298_s0 = inlined_call_operand.hbm [shape: f32[16,128], index: 0, kind: input, shape index: {}]   ;;  %s299_s1 = inlined_call_operand.hbm [shape: f32[16,128], index: 1, kind: input, shape index: {}]   ;;  %s300_s2 = inlined_call_operand.hbm [shape: f32[8,128], index: 2, kind: output, shape index: {}]  }
   0x1   :  { %8 = vsyncpa [#allocation6], 0 }
   0x2   :  { %9 = vsyncpa [#allocation4], 0  ;;  %s20_s11 = sshll.u32 %s298_s0, 4  ;;  %s257_s12 = smov [#allocation2]   ;;  %s21_s11 = int_to_ptr.hbm [resolvable:$true] %s20_s11 }
   0x3   :  { %s22_s13 = sshll.u32 %s257_s12, 4  ;;  %s39_s16 = sshll.u32 %s299_s1, 4  ;;  %s23_s13 = int_to_ptr.vmem [resolvable:$true] %s22_s13  ;;  %s40_s16 = int_to_ptr.hbm [resolvable:$true] %s39_s16 }
   0x4   :  { %s258_s17 = smov 128   ;;  %s259_s18 = smov 8  }
   0x5   :  { %28 = dma.hbm_to_vmem [thread:$0]  %s21_s11, 256, %s23_s13, [#allocation3], %s258_s17, %s258_s17, %s259_s18  }
   0x6   :  { %s260_s19 = smov [#allocation5]  }
   0x7   :  { %s41_s20 = sshll.u32 %s260_s19, 4  ;;  %s42_s20 = int_to_ptr.vmem [resolvable:$true] %s41_s20 }
   0x8   :  { %47 = dma.hbm_to_vmem [thread:$0]  %s40_s16, 256, %s42_s20, [#allocation6], %s258_s17, %s258_s17, %s259_s18  }
   0x9   :  { %251 = dma.done.wait [#allocation3], 256  }
   0xa   :  { %252 = vsyncadd [#allocation3], 4294967040 }
   0xb   :  { %253 = dma.done.wait [#allocation6], 256  }
   0xc   :  { %254 = vsyncadd [#allocation6], 4294967040  ;;  %v69_v0 = vld [vmem:[#allocation2] sm:$0xff]  ;;  %v70_v1 = vld [vmem:[#allocation2 + $0x8] sm:$0xff]  ;;  %s261_s0 = smov [#allocation7]   ;;  %s146_s23 = sshll.u32 %s300_s2, 4  ;;  %s147_s23 = int_to_ptr.hbm [resolvable:$true] %s146_s23 }
   0xd   :  { %v73_v2 = vand.u32 2147483647, %v69_v0  ;;  %v74_v3 = vand.u32 2147483647, %v70_v1  ;;  %v71_v15 = vld [vmem:[#allocation5] sm:$0xff]  ;;  %v91_v18 = vmax.f32 %v69_v0, 0.0 }
   0xe   :  { %v93_v19 = vmul.f32 %v71_v15, %v69_v0  ;;  %v72_v22 = vld [vmem:[#allocation5 + $0x8] sm:$0xff]  ;;  %vm85_vm0 = vcmp.ge.f32.partialorder %v69_v0, 0.0  ;;  %vm86_vm1 = vcmp.ge.f32.partialorder %v70_v1, 0.0  ;;  %v92_v25 = vmax.f32 %v70_v1, 0.0  ;;  %s144_s1 = sshll.u32 %s261_s0, 4  ;;  %s145_s1 = int_to_ptr.vmem [resolvable:$true] %s144_s1 }
   0xf   :  { %v75_v4 = vsub.f32 0.0, %v73_v2  ;;  %v76_v5 = vsub.f32 0.0, %v74_v3  ;;  %v94_v26 = vmul.f32 %v72_v22, %v70_v1  ;;  %v129_v47 = vmul.f32 -0.5, %v71_v15 }
  0x10   :  { %v95_v34 = vsub.f32 %v91_v18, %v93_v19  ;;  %v130_v49 = vmul.f32 -0.5, %v72_v22 }
  0x11   :  { %v77_v6 = vmul.f32 1.442695, %v75_v4  ;;  %v79_v7 = vmul.f32 1.442695, %v76_v5  ;;  %v96_v41 = vsub.f32 %v92_v25, %v94_v26  ;;  %v131_v55 = vadd.f32 0.75, %v129_v47 }
  0x12   :  { %v132_v57 = vadd.f32 0.75, %v130_v49 }
  0x13   :  { %167 = vpow2.f32 %v77_v6 }
  0x14   :  { %169 = vpow2.f32 %v79_v7 }
  0x19   :  { %v168_v8 = vpop.eup %167 }
  0x1a   :  { %v170_v9 = vpop.eup %169  ;;  %v81_v10 = vadd.f32 1.0, %v168_v8  ;;  %v100_v12 = vmul.f32 -0.5, %v168_v8  ;;  %v103_v16 = vand.u32 2147483647, %v168_v8 }
  0x1b   :  { %v82_v11 = vadd.f32 1.0, %v170_v9  ;;  %v109_v13 = vmul.f32 -0.5, %v170_v9  ;;  %v112_v20 = vand.u32 2147483647, %v170_v9 }
  0x1c   :  { %171 = vrcp.f32 %v81_v10  ;;  %v101_v14 = vadd.f32 1.0, %v100_v12  ;;  %vm283_vm2 = vcmp.lt.f32.partialorder %v103_v16, 0.0004427343 }
  0x1d   :  { %173 = vrcp.f32 %v82_v11  ;;  %v110_v17 = vadd.f32 1.0, %v109_v13  ;;  %vm287_vm3 = vcmp.lt.f32.partialorder %v112_v20, 0.0004427343 }
  0x1e   :  { %175 = vlog2.f32 %v81_v10  ;;  %v102_v27 = vmul.f32 %v168_v8, %v101_v14 }
  0x1f   :  { %177 = vlog2.f32 %v82_v11  ;;  %v111_v31 = vmul.f32 %v170_v9, %v110_v17 }
  0x22   :  { %v172_v21 = vpop.eup %171 }
  0x23   :  { %v174_v23 = vpop.eup %173  ;;  %v87_v24 = vmul.f32 %v172_v21, %v168_v8 }
  0x24   :  { %v176_v28 = vpop.eup %175  ;;  %v88_v29 = vmul.f32 %v174_v23, %v170_v9 }
  0x25   :  { %v178_v32 = vpop.eup %177  ;;  %v89_v33 = vsel %vm85_vm0, %v172_v21, %v87_v24  ;;  %v99_v35 = vmul.f32 0.6931472, %v176_v28 }
  0x26   :  { %v90_v37 = vsel %vm86_vm1, %v174_v23, %v88_v29  ;;  %v108_v38 = vmul.f32 0.6931472, %v178_v32  ;;  %v117_v39 = vadd.f32 %v89_v33, %v71_v15  ;;  %v119_v40 = vmul.f32 %v89_v33, %v71_v15 }
  0x27   :  { %v105_v42 = vsel %vm283_vm2, %v102_v27, %v99_v35  ;;  %v118_v43 = vadd.f32 %v90_v37, %v72_v22  ;;  %v120_v44 = vmul.f32 %v90_v37, %v72_v22 }
  0x28   :  { %v114_v45 = vsel %vm287_vm3, %v111_v31, %v108_v38  ;;  %v121_v46 = vmul.f32 2.0, %v119_v40  ;;  %v115_v50 = vadd.f32 %v105_v42, %v95_v34 }
  0x29   :  { %v122_v48 = vmul.f32 2.0, %v120_v44  ;;  %v116_v52 = vadd.f32 %v114_v45, %v96_v41 }
  0x2a   :  { %v123_v51 = vsub.f32 %v117_v39, %v121_v46 }
  0x2b   :  { %v124_v53 = vsub.f32 %v118_v43, %v122_v48 }
  0x2c   :  { %v125_v54 = vmul.f32 %v123_v51, %v123_v51 }
  0x2d   :  { %v126_v56 = vmul.f32 %v124_v53, %v124_v53 }
  0x2e   :  { %v127_v58 = vmul.f32 %v125_v54, %v115_v50 }
  0x2f   :  { %v128_v59 = vmul.f32 %v126_v56, %v116_v52 }
  0x30   :  { %v133_v60 = vmul.f32 %v131_v55, %v127_v58 }
  0x31   :  { %v134_v61 = vmul.f32 %v132_v57, %v128_v59 }
  0x33   :  { %v136_v62 = vadd.f32 %v134_v61, %v133_v60 }
  0x35   :  { %138 = vst [vmem:[#allocation7] sm:$0xff] %v136_v62 }
  0x36   :  { %149 = dma.vmem_to_hbm [thread:$0]  %s145_s1, 128, %s147_s23, [#allocation4]  }
  0x37   :  { %255 = dma.done.wait [#allocation4], 128  }
  0x38   :  { %256 = vsyncadd [#allocation4], 4294967168 }
  0x39   :  { %154 = vsyncpa [#allocation3], 1 }
  0x3a   :  { %155 = vsyncpa [#allocation6], 1 }
  0x3b   :  { %156 = vsyncpa [#allocation4], 1 }

</bundles_post_ra>
